<compile_context>
chip_gen: v7x
topology: tpu7x:2x2x1
jax: 0.10.0
libtpu: 0.0.40
codegen_flags: <defaults>
</compile_context>

<pallas_src>
from functools import partial

import jax
import jax.numpy as jnp
from jax.experimental import pallas as pl
from jax.experimental.pallas import tpu as pltpu


# ---------------------------------------------------------------------------
# Kernel
# ---------------------------------------------------------------------------
def make_value_net_kernel(layer_modes):
    """Fused MLP kernel.

    layer_modes[i] is:
      "dot"     -> weight stored (in, out), bias (1, out): MXU matmul path.
      "vpu_row" -> final 1-output layer, weight stored (1, in), bias (1, 1):
                   VPU broadcast-multiply + XLU lane reduce (avoids a 1-lane
                   MXU pass and its result-FIFO drain).
    """
    num_layers = len(layer_modes)

    def kernel(*refs):
        x_ref = refs[0]
        o_ref = refs[-1]
        param_refs = refs[1:-1]

        h = x_ref[...]
        if h.dtype != jnp.float32:
            h = h.astype(jnp.float32)
        for i, mode in enumerate(layer_modes):
            w = param_refs[2 * i][...]
            b = param_refs[2 * i + 1][...]
            if mode == "vpu_row":
                # (B, in) * (1, in) broadcast + lane reduce -> (B, 1)
                h = jnp.sum(h * w, axis=-1, keepdims=True) + b
            else:
                h = jnp.dot(h, w, preferred_element_type=jnp.float32) + b
            if i != num_layers - 1:  # no ReLU after the final Linear
                h = jnp.maximum(h, 0.0)
        o_ref[...] = h.astype(o_ref.dtype)

    return kernel


# ---------------------------------------------------------------------------
# Parameters
# ---------------------------------------------------------------------------
def init_torch_mlp_params(key, input_dim, mlp_dims):
    """PyTorch nn.Linear-style params: weight (out, in), bias (out,),
    init U[-1/sqrt(fan_in), 1/sqrt(fan_in)]."""
    dims = [input_dim] + list(mlp_dims)
    params = []
    for i in range(len(dims) - 1):
        fan_in, fan_out = dims[i], dims[i + 1]
        key, kw, kb = jax.random.split(key, 3)
        bound = 1.0 / jnp.sqrt(jnp.float32(fan_in))
        w = jax.random.uniform(kw, (fan_out, fan_in), jnp.float32, -bound, bound)
        b = jax.random.uniform(kb, (fan_out,), jnp.float32, -bound, bound)
        params.append((w, b))
    return params


def prepare_params(torch_params):
    """ONE-TIME conversion of PyTorch-layout params to kernel-ready layout
    (call at init, never inside the forward loop):
      * general layers:        w -> (in, out), b -> (1, out)   ("dot")
      * final layer, out == 1: w -> (1, in),   b -> (1, 1)     ("vpu_row")
    Returns (flat_param_tuple, layer_modes, final_out_dim)."""
    n = len(torch_params)
    flat, modes = [], []
    for i, (w, b) in enumerate(torch_params):
        w = jnp.asarray(w, jnp.float32)
        b = jnp.asarray(b, jnp.float32)
        out_dim, in_dim = w.shape
        if i == n - 1 and out_dim == 1:
            flat.extend([w.reshape(1, in_dim), b.reshape(1, 1)])
            modes.append("vpu_row")
        else:
            flat.extend([w.T, b.reshape(1, out_dim)])
            modes.append("dot")
    final_out = int(torch_params[-1][0].shape[0])
    return tuple(flat), tuple(modes), final_out


# ---------------------------------------------------------------------------
# Forward pass (jit-friendly: static config separated from array params)
# ---------------------------------------------------------------------------
@partial(jax.jit, static_argnames=("layer_modes", "out_dim", "block_batch"))
def value_network_pallas(state, flat_params, *, layer_modes, out_dim,
                         block_batch=512):
    """Run the ValueNetwork forward pass in a single fused Pallas kernel.

    state:       (B, input_dim) float32
    flat_params: tuple from prepare_params (kernel-ready layout)
    layer_modes: static tuple of "dot"/"vpu_row" per layer
    out_dim:     static final output width
    """
    B, in_dim = state.shape
    kernel = make_value_net_kernel(layer_modes)
    n_args = 1 + len(flat_params)

    if B <= block_batch:
        # Single whole-array VMEM call: no grid / pipelining overhead.
        return pl.pallas_call(
            kernel,
            out_shape=jax.ShapeDtypeStruct((B, out_dim), jnp.float32),
            in_specs=[pl.BlockSpec(memory_space=pltpu.MemorySpace.VMEM)] * n_args,
            out_specs=pl.BlockSpec(memory_space=pltpu.MemorySpace.VMEM),
        )(state, *flat_params)

    # ---- large batch: 1-D grid over batch tiles ---------------------------
    assert block_batch % 8 == 0, "batch tile must be a multiple of 8 (f32 sublane)"
    tb = block_batch
    num_tiles = pl.cdiv(B, tb)
    b_pad = num_tiles * tb
    if b_pad != B:
        state = jnp.pad(state, ((0, b_pad - B), (0, 0)))

    in_specs = [pl.BlockSpec((tb, in_dim), lambda i: (i, 0))]
    for p in flat_params:
        # Full-array block + constant index_map -> weight stays VMEM-resident
        # across all grid steps (no repeated weight DMA).
        in_specs.append(pl.BlockSpec(p.shape, lambda i: (0, 0)))

    out = pl.pallas_call(
        kernel,
        out_shape=jax.ShapeDtypeStruct((b_pad, out_dim), jnp.float32),
        grid=(num_tiles,),
        in_specs=in_specs,
        out_specs=pl.BlockSpec((tb, out_dim), lambda i: (i, 0)),
        compiler_params=pltpu.CompilerParams(
            dimension_semantics=("parallel",)),  # use both TCs on v7x
    )(state, *flat_params)
    return out[:B]


# ---------------------------------------------------------------------------
# Pure-JAX reference (PyTorch semantics, PyTorch-layout params)
# ---------------------------------------------------------------------------
def value_network_ref(state, torch_params):
    h = state
    for i, (w, b) in enumerate(torch_params):
        h = h @ w.T + b
        if i != len(torch_params) - 1:
            h = jnp.maximum(h, 0.0)
    return h


if __name__ == "__main__":
    key = jax.random.PRNGKey(0)

    # Shapes consistent with CADRL's ValueNetwork (joint state -> scalar value).
    input_dim = 16
    mlp_dims = [32, 32, 1]

    key, k_state, k_params, k_big = jax.random.split(key, 4)
    torch_params = init_torch_mlp_params(k_params, input_dim, mlp_dims)
    flat_params, layer_modes, out_dim = prepare_params(torch_params)  # one-time

    fwd = partial(value_network_pallas, layer_modes=layer_modes, out_dim=out_dim)

    # 1) Small batch: single whole-array VMEM call.
    state = jax.random.normal(k_state, (8, input_dim), dtype=jnp.float32)
    out = fwd(state, flat_params)
    jax.block_until_ready(out)
    ref = value_network_ref(state, torch_params)
    assert out.shape == (8, mlp_dims[-1])
    assert jnp.allclose(out, ref, atol=1e-5, rtol=1e-5), "small-batch mismatch"

    # 2) Batched path: many candidate states scored in ONE pallas_call
    #    (exercises the batch grid + padding + VMEM-resident weights).
    big_state = jax.random.normal(k_big, (200, input_dim), dtype=jnp.float32)
    big_out = fwd(big_state, flat_params, block_batch=64)
    jax.block_until_ready(big_out)
    big_ref = value_network_ref(big_state, torch_params)
    assert big_out.shape == (200, mlp_dims[-1])
    assert jnp.allclose(big_out, big_ref, atol=1e-5, rtol=1e-5), "batched mismatch"

    print("KERNEL_OK")
</pallas_src>

<mosaic_0001>
module attributes {stable_mosaic.version = 11 : i64} {
  func.func @kernel(%arg0: memref<8x16xf32, #tpu.memory_space<vmem>>, %arg1: memref<16x32xf32, #tpu.memory_space<vmem>>, %arg2: memref<1x32xf32, #tpu.memory_space<vmem>>, %arg3: memref<32x32xf32, #tpu.memory_space<vmem>>, %arg4: memref<1x32xf32, #tpu.memory_space<vmem>>, %arg5: memref<1x32xf32, #tpu.memory_space<vmem>>, %arg6: memref<1x1xf32, #tpu.memory_space<vmem>>, %arg7: memref<8x1xf32, #tpu.memory_space<vmem>>) attributes {dimension_semantics = [], scalar_prefetch = 0 : i64, scratch_operands = 0 : i64, tpu.core_type = #tpu.core_type<tc>} {
    %c0 = arith.constant 0 : index
    %c0_0 = arith.constant 0 : index
    %0 = vector.load %arg0[%c0, %c0_0] : memref<8x16xf32, #tpu.memory_space<vmem>>, vector<8x16xf32>
    %c0_1 = arith.constant 0 : index
    %c0_2 = arith.constant 0 : index
    %1 = vector.load %arg1[%c0_1, %c0_2] : memref<16x32xf32, #tpu.memory_space<vmem>>, vector<16x32xf32>
    %c0_3 = arith.constant 0 : index
    %c0_4 = arith.constant 0 : index
    %2 = vector.load %arg2[%c0_3, %c0_4] : memref<1x32xf32, #tpu.memory_space<vmem>>, vector<1x32xf32>
    %cst = arith.constant dense<0.000000e+00> : vector<8x32xf32>
    %3 = tpu.matmul %0, %1, %cst {dimension_numbers = #tpu.dot_dimension_numbers<[1], [0], [0], [1], [0, 0, 1, 1], [], []>} : vector<8x16xf32>, vector<16x32xf32>, vector<8x32xf32> -> vector<8x32xf32>
    %4 = vector.broadcast %2 : vector<1x32xf32> to vector<8x32xf32>
    %5 = arith.addf %3, %4 : vector<8x32xf32>
    %cst_5 = arith.constant 0.000000e+00 : f32
    %6 = vector.broadcast %cst_5 : f32 to vector<8x32xf32>
    %7 = arith.maximumf %5, %6 : vector<8x32xf32>
    %c0_6 = arith.constant 0 : index
    %c0_7 = arith.constant 0 : index
    %8 = vector.load %arg3[%c0_6, %c0_7] : memref<32x32xf32, #tpu.memory_space<vmem>>, vector<32x32xf32>
    %c0_8 = arith.constant 0 : index
    %c0_9 = arith.constant 0 : index
    %9 = vector.load %arg4[%c0_8, %c0_9] : memref<1x32xf32, #tpu.memory_space<vmem>>, vector<1x32xf32>
    %cst_10 = arith.constant dense<0.000000e+00> : vector<8x32xf32>
    %10 = tpu.matmul %7, %8, %cst_10 {dimension_numbers = #tpu.dot_dimension_numbers<[1], [0], [0], [1], [0, 0, 1, 1], [], []>} : vector<8x32xf32>, vector<32x32xf32>, vector<8x32xf32> -> vector<8x32xf32>
    %11 = vector.broadcast %9 : vector<1x32xf32> to vector<8x32xf32>
    %12 = arith.addf %10, %11 : vector<8x32xf32>
    %cst_11 = arith.constant 0.000000e+00 : f32
    %13 = vector.broadcast %cst_11 : f32 to vector<8x32xf32>
    %14 = arith.maximumf %12, %13 : vector<8x32xf32>
    %c0_12 = arith.constant 0 : index
    %c0_13 = arith.constant 0 : index
    %15 = vector.load %arg5[%c0_12, %c0_13] : memref<1x32xf32, #tpu.memory_space<vmem>>, vector<1x32xf32>
    %c0_14 = arith.constant 0 : index
    %c0_15 = arith.constant 0 : index
    %16 = vector.load %arg6[%c0_14, %c0_15] : memref<1x1xf32, #tpu.memory_space<vmem>>, vector<1x1xf32>
    %17 = vector.broadcast %15 : vector<1x32xf32> to vector<8x32xf32>
    %18 = arith.mulf %14, %17 : vector<8x32xf32>
    %cst_16 = arith.constant dense<0.000000e+00> : vector<8xf32>
    %19 = vector.multi_reduction <add>, %18, %cst_16 [1] : vector<8x32xf32> to vector<8xf32>
    %20 = vector.shape_cast %19 : vector<8xf32> to vector<8x1xf32>
    %21 = vector.broadcast %16 : vector<1x1xf32> to vector<8x1xf32>
    %22 = arith.addf %20, %21 : vector<8x1xf32>
    %c0_17 = arith.constant 0 : index
    %c0_18 = arith.constant 0 : index
    %23 = vector.load %arg7[%c0_17, %c0_18] : memref<8x1xf32, #tpu.memory_space<vmem>>, vector<8x1xf32>
    tpu.vector_store %arg7[%c0_17, %c0_18], %22 {strides = array<i32>} : memref<8x1xf32, #tpu.memory_space<vmem>>, vector<8x1xf32>,
    return
  }
}

</mosaic_0001>

<bundles_post_ra>
// kernel: value_network_pallas.1
= control target key start
LH: loop header
LB: loop body
LE: loop exit
PB: predicated region body
PF: predicated region fallthrough
CT: control target
= control target key end

     0   :  { %s489_s0 = inlined_call_operand.hbm [shape: f32[8,16], index: 0, kind: input, shape index: {}]   ;;  %s490_s1 = inlined_call_operand.hbm [shape: f32[16,32], index: 1, kind: input, shape index: {}]   ;;  %s491_s2 = inlined_call_operand.vmem [shape: f32[1,32], index: 2, kind: input, shape index: {}]   ;;  %s492_s3 = inlined_call_operand.hbm [shape: f32[32,32], index: 3, kind: input, shape index: {}]   ;;  %s493_s4 = inlined_call_operand.vmem [shape: f32[1,32], index: 4, kind: input, shape index: {}]   ;;  %s494_s5 = inlined_call_operand.vmem [shape: f32[1,32], index: 5, kind: input, shape index: {}]   ;;  %s495_s6 = inlined_call_operand.<no memory space> [shape: f32[1,1], index: 6, kind: input, shape index: {}]   ;;  %s496_s7 = inlined_call_operand.vmem [shape: f32[8,1], index: 7, kind: output, shape index: {}]  }
   0x1   :  { %v12_v0 = vstv %s495_s6 }
   0x2   :  { %13 = vst [vmem:[#allocation2] sm:$0x1] %v12_v0 }
   0x3   :  { %14 = vsyncpa [#allocation4], 0 }
   0x4   :  { %15 = vsyncpa [#allocation6], 0  ;;  %s384_s26 = smov [#allocation5]   ;;  %s314_s30 = scalar_lea.hbm %s490_s1, 256 }
   0x5   :  { %s31_s27 = sshll.u32 %s384_s26, 4  ;;  %p315_p0 = scmp.ne.s32.totalorder %s490_s1, %s314_s30  ;;  %s32_s27 = int_to_ptr.vmem [resolvable:$true] %s31_s27 }
   0x6   :  { %p318_p1 = scmp.lt.u32.totalorder %s314_s30, %s490_s1 }
   0x8   :  { %p320_p2 = pnand %p318_p1, %p315_p0 }
   0xa   :  { %323 = shalt.err (!%p320_p2)
}
   0xb   :  { %s324_s6 = scalar_lea.vmem %s32_s27, 256  ;;  %p329_p4 = scmp.lt.s32.totalorder %s32_s27, %s32_s27 }
   0xc   :  { %p325_p3 = scmp.ne.s32.totalorder %s32_s27, %s324_s6  ;;  %p330_p5 = scmp.lt.s32.totalorder %s324_s6, %s324_s6 }
   0xe   :  { %p331_p6 = por %p330_p5, %p329_p4 }
  0x10   :  { %p332_p7 = pnand %p331_p6, %p325_p3 }
  0x12   :  { %335 = shalt.err (!%p332_p7)
}
  0x13   :  { %s385_s12 = smov 128   ;;  %s386_s13 = smov 8  }
  0x14   :  { %37 = dma.hbm_to_vmem [thread:$0]  %s490_s1, 256, %s32_s27, [#allocation6], %s385_s12, %s385_s12, %s386_s13  }
  0x15   :  { %s387_s16 = smov [#allocation3]   ;;  %s388_s18 = smov [#allocation7]  }
  0x16   :  { %s22_s17 = sshll.u32 %s387_s16, 4  ;;  %s45_s19 = sshll.u32 %s388_s18, 4  ;;  %s23_s17 = int_to_ptr.vmem [resolvable:$true] %s22_s17  ;;  %s46_s19 = int_to_ptr.vmem [resolvable:$true] %s45_s19 }
  0x17   :  { %s336_s22 = scalar_lea.hbm %s489_s0, 128 }
  0x18   :  { %p337_p8 = scmp.ne.s32.totalorder %s489_s0, %s336_s22  ;;  %p340_p9 = scmp.lt.u32.totalorder %s336_s22, %s489_s0 }
  0x1a   :  { %p342_p10 = pnand %p340_p9, %p337_p8 }
  0x1c   :  { %345 = shalt.err (!%p342_p10)
}
  0x1d   :  { %s346_s1 = scalar_lea.vmem %s23_s17, 128  ;;  %p351_p12 = scmp.lt.s32.totalorder %s23_s17, %s23_s17 }
  0x1e   :  { %p347_p11 = scmp.ne.s32.totalorder %s23_s17, %s346_s1  ;;  %p352_p13 = scmp.lt.s32.totalorder %s346_s1, %s346_s1 }
  0x20   :  { %p353_p0 = por %p352_p13, %p351_p12 }
  0x22   :  { %p354_p1 = pnand %p353_p0, %p347_p11 }
  0x24   :  { %357 = shalt.err (!%p354_p1)
}
  0x25   :  { %25 = dma.hbm_to_vmem [thread:$0]  %s489_s0, 128, %s23_s17, [#allocation4]  }
  0x26   :  { %s358_s8 = scalar_lea.hbm %s492_s3, 512 }
  0x27   :  { %p359_p2 = scmp.ne.s32.totalorder %s492_s3, %s358_s8  ;;  %p362_p3 = scmp.lt.u32.totalorder %s358_s8, %s492_s3 }
  0x29   :  { %p364_p4 = pnand %p362_p3, %p359_p2 }
  0x2b   :  { %367 = shalt.err (!%p364_p4)
}
  0x2c   :  { %s368_s14 = scalar_lea.vmem %s46_s19, 512  ;;  %p373_p6 = scmp.lt.s32.totalorder %s46_s19, %s46_s19 }
  0x2d   :  { %p369_p5 = scmp.ne.s32.totalorder %s46_s19, %s368_s14  ;;  %p374_p7 = scmp.lt.s32.totalorder %s368_s14, %s368_s14 }
  0x2f   :  { %p375_p8 = por %p374_p7, %p373_p6 }
  0x31   :  { %p376_p9 = pnand %p375_p8, %p369_p5 }
  0x33   :  { %379 = shalt.err (!%p376_p9)
}
  0x34   :  { %51 = dma.hbm_to_vmem [thread:$0]  %s492_s3, 512, %s46_s19, [#allocation6], %s385_s12, %s385_s12, %s386_s13  }
  0x35   :  { %380 = dma.done.wait [#allocation4], 128  }
  0x36   :  { %381 = vsyncadd [#allocation4], 4294967168 }
  0x37   :  { %382 = dma.done.wait [#allocation6], 768  }
  0x38   :  { %383 = vsyncadd [#allocation6], 4294966528  ;;  %v389_v1 = vmov 0.0|0.0   ;;  %vm390_vm0 = vmmov 0   ;;  %v391_v2 = vmov 0.0   ;;  %v68_v3 = vld [vmem:[#allocation5] sm:$0xff] }
  0x39   :  { %297 = vmatprep.subr.bf16.mxu0 %v389_v1  ;;  %283 = vmatprep.mubr.msk.f32.mxu0 %vm390_vm0, %v391_v2  ;;  %v69_v4 = vld [vmem:[#allocation5 + $0x8] sm:$0xff]  ;;  %v152_v6 = vld [vmem:[#allocation7] sm:$0xff]  ;;  %v153_v7 = vld [vmem:[#allocation7 + $0x8] sm:$0xff]  ;;  %vm77_vm1 = vcmask 130048   ;;  %vm163_vm2 = vcmask 261120   ;;  %vm257_vm3 = vcmask 7168  }
  0x3a   :  { %300 = vmatprep.subr.bf16.mxu1 %v389_v1  ;;  %294 = vmatprep.mubr.msk.f32.mxu1 %vm390_vm0, %v391_v2  ;;  %v298_v5 = vpack.c.bf16 %v69_v4, %v68_v3  ;;  %v301_v8 = vpack.c.bf16 %v153_v7, %v152_v6  ;;  %v67_v9 = vld [vmem:[#allocation3] sm:$0xff]  ;;  %v154_v10 = vld [vmem:[#allocation7 + $0x10] sm:$0xff]  ;;  %v155_v11 = vld [vmem:[#allocation7 + $0x18] sm:$0xff] }
  0x3b   :  { %v304_v12 = vpack.c.bf16 %v155_v11, %v154_v10  ;;  %v265_v13 = vld [vmem:[%s491_s2] ss:$0 sm:$0xff] }
  0x3c   :  { %299 = vmatpush3.bf16.msra.mxu0 %v298_v5  ;;  %302 = vmatpush3.bf16.msra.mxu1 %v301_v8  ;;  %v267_v18 = vld [vmem:[%s493_s4] ss:$0 sm:$0xff] }
  0x3d   :  { %303 = vmatprep.subr.bf16.mxu1 %v389_v1  ;;  %v269_v22 = vld [vmem:[%s494_s5] ss:$0 sm:$0xff] }
  0x3e   :  { %v270_v26 = vld [vmem:[#allocation2] ss:$0 sm:$0xff] }
  0x3f   :  { %284 = vmatmul.mubr.msk.f32.vlgmr.msra.gmra.mrb[0].mxu0 %vm77_vm1, %v67_v9 }
  0x40   :  { %305 = vmatpush3.bf16.msra.mxu1 %v304_v12 }
 0x112   :  { %v147_v14 = vpop.f32.mrb[0].mxu0 }
 0x113   :  { %v148_v15 = vadd.f32 %v265_v13, %v147_v14  ;;  %v285_v16 = vpop.f32.mrb[1].mxu0 }
 0x115   :  { %v151_v17 = vmax.f32 %v148_v15, 0.0 }
 0x117   :  { %295 = vmatmul.mubr.msk.f32.vlgmr.msra.gmra.mrb[0].mxu1 %vm163_vm2, %v151_v17 }
 0x1ea   :  { %v233_v19 = vpop.f32.mrb[0].mxu1 }
 0x1eb   :  { %v234_v20 = vadd.f32 %v267_v18, %v233_v19  ;;  %v296_v21 = vpop.f32.mrb[1].mxu1 }
 0x1ed   :  { %v237_v23 = vmax.f32 %v234_v20, 0.0 }
 0x1ef   :  { %v246_v24 = vmul.f32 %v269_v22, %v237_v23 }
 0x1f1   :  { %v247_v25 = vsel %vm163_vm2, %v246_v24, 0.0 }
 0x1f2   :  { %248 = vadd.xlane.f32.xlu0 %v247_v25 }
 0x27f   :  { %v249_v27 = vpop.xlane.xlu0 %248 }
 0x280   :  { %v256_v28 = vadd.f32 %v270_v26, %v249_v27 }
 0x282   :  { %258 = vst.msk [vmem:[%s496_s7] sm:$0xff] %vm257_vm3, %v256_v28 }
 0x283   :  { %263 = vsyncpa [#allocation4], 1 }
 0x284   :  { %264 = vsyncpa [#allocation6], 1 }

</bundles_post_ra>
